<compile_context>
chip_gen: v6e
topology: v6e:2x2x1
jax: 0.10.0
libtpu: 0.0.40
codegen_flags: <defaults>
</compile_context>

<pallas_src>
import jax
import jax.numpy as jnp
from jax import lax
from jax.experimental import pallas as pl
from jax.experimental.pallas import tpu as pltpu


def _round_up(n, m):
    return ((n + m - 1) // m) * m


def _pad2(a, rows, cols):
    """Zero-pad a 2-D array up to (rows, cols)."""
    return jnp.pad(a, ((0, rows - a.shape[0]), (0, cols - a.shape[1])))


def _pick_tile_b(batch, n_in, f1, f2, f3, chunk=256):
    """Largest batch tile (multiple of 128, capped at 4096) that keeps the streamed
    f32 x tile, the VMEM-resident weights and the per-chunk activation workspace
    under a 24 MiB budget (vmem_limit_bytes below is 32 MiB; v7x physical is 64 MiB)."""
    b128 = _round_up(batch, 128)
    # Fixed costs: (conservatively 2x-buffered) bf16 weights + f32 biases, plus the
    # per-chunk f32/bf16 activations and transpose staging inside the kernel.
    weight_bytes = 2 * (2 * (n_in * f1 + f1 * f2 + f2 * f3 + f3)
                        + 4 * (f1 + f2 + f3 + 1))
    chunk_workspace = 3 * chunk * max(f1, f2, f3) * (4 + 2)
    budget = (24 << 20) - weight_bytes - chunk_workspace
    per_row = 2 * (n_in * 4) + 2 * 4          # 2x-buffered f32 x row + f32 output
    tile = (budget // per_row) // 128 * 128
    tile = max(128, min(4096, tile))
    # v7x: keep >=2 grid steps so both TensorCores get work (no-op on v5e/v6e).
    if b128 >= 256:
        tile = min(tile, _round_up(pl.cdiv(b128, 2), 128))
    return min(tile, b128)


def _make_mlp_kernel(chunk):
    """Kernel factory: `chunk` rows are pushed through all 4 layers at a time so each
    layer's activations stay close to the vreg file (reduces vld/vst epilogue traffic,
    especially on v5e's single store slot)."""

    def _mlp_kernel(x_ref, w1_ref, b1_ref, w2_ref, b2_ref,
                    w3_ref, b3_ref, w4t_ref, b4_ref, o_ref):
        n_chunks = x_ref.shape[0] // chunk      # static Python int

        def body(c, carry):
            r = pl.multiple_of(c * chunk, chunk)
            # x streamed at natural width (f32); cast to bf16 in-kernel.
            x = x_ref[pl.ds(r, chunk), :].astype(jnp.bfloat16)       # [chunk, n_in]

            # linear1 + ReLU (dropout -> identity in eval mode)
            h = jnp.dot(x, w1_ref[...],
                        preferred_element_type=jnp.float32) + b1_ref[...]
            h = jnp.maximum(h, 0.0).astype(jnp.bfloat16)

            # linear2 + ReLU
            h = jnp.dot(h, w2_ref[...],
                        preferred_element_type=jnp.float32) + b2_ref[...]
            h = jnp.maximum(h, 0.0).astype(jnp.bfloat16)

            # linear3 + ReLU  (cast to bf16 BEFORE the transpose: half the XLU work)
            h = jnp.dot(h, w3_ref[...],
                        preferred_element_type=jnp.float32) + b3_ref[...]
            h3 = jnp.maximum(h, 0.0).astype(jnp.bfloat16)            # [chunk, F3]

            # linear4 + sigmoid, computed transposed -> lane-dense (1, chunk) store.
            # (Alternative to benchmark: dot(h3, w4) -> (chunk, 1) masked column.)
            logits = jnp.dot(w4t_ref[...], h3.T,
                             preferred_element_type=jnp.float32) + b4_ref[...]
            o_ref[:, pl.ds(r, chunk)] = jax.nn.sigmoid(logits)       # [1, chunk] f32
            return carry

        lax.fori_loop(0, n_chunks, body, 0, unroll=True)

    return _mlp_kernel


def prepare_params(params):
    """One-time weight/bias padding + bf16 casts (hoisted out of the forward call).
    Weights are stored [in, out]; only the output dims are padded to 128 multiples
    (w1 keeps its natural input width so x can be streamed unpadded)."""
    w1, b1 = params["l1"]
    w2, b2 = params["l2"]
    w3, b3 = params["l3"]
    w4, b4 = params["l4"]

    n_in = w1.shape[0]
    F1 = _round_up(w1.shape[1], 128)
    F2 = _round_up(w2.shape[1], 128)
    F3 = _round_up(w3.shape[1], 128)

    tensors = (
        _pad2(w1, n_in, F1).astype(jnp.bfloat16),   # [n_in, F1]
        _pad2(b1, 1, F1).astype(jnp.float32),
        _pad2(w2, F1, F2).astype(jnp.bfloat16),
        _pad2(b2, 1, F2).astype(jnp.float32),
        _pad2(w3, F2, F3).astype(jnp.bfloat16),
        _pad2(b3, 1, F3).astype(jnp.float32),
        _pad2(w4.T, 1, F3).astype(jnp.bfloat16),    # [1, F3]
        b4.reshape(1, 1).astype(jnp.float32),
    )
    tensors = tuple(jax.device_put(t) for t in tensors)
    return {"n_in": n_in, "F1": F1, "F2": F2, "F3": F3, "tensors": tensors}


def simple_dnn_forward(x, prep):
    """x: [B, n_in] float32; prep: output of prepare_params()."""
    B, n_in = x.shape
    assert n_in == prep["n_in"]
    F1, F2, F3 = prep["F1"], prep["F2"], prep["F3"]
    w1p, b1p, w2p, b2p, w3p, b3p, w4tp, b4p = prep["tensors"]

    TILE_B = _pick_tile_b(B, n_in, F1, F2, F3)
    CHUNK = 256 if TILE_B % 256 == 0 else 128
    B_pad = _round_up(B, TILE_B)
    grid = (B_pad // TILE_B,)

    # Only the batch axis is padded; x stays f32 at its natural feature width.
    xp = jnp.pad(x, ((0, B_pad - B), (0, 0)))

    # Weights/biases use constant index_maps -> loaded once, VMEM-resident.
    const = lambda shape: pl.BlockSpec(shape, lambda i: (0, 0))

    weight_bytes = 2 * (n_in * F1 + F1 * F2 + F2 * F3 + F3) + 4 * (F1 + F2 + F3 + 1)
    cost = pl.CostEstimate(
        flops=2 * B_pad * (n_in * F1 + F1 * F2 + F2 * F3 + F3),
        transcendentals=B_pad,
        bytes_accessed=B_pad * (n_in * 4 + 4) + weight_bytes,
    )

    out = pl.pallas_call(
        _make_mlp_kernel(CHUNK),
        grid=grid,
        in_specs=[
            pl.BlockSpec((TILE_B, n_in), lambda i: (i, 0)),    # x: streamed, unpadded width
            const((n_in, F1)), const((1, F1)),                 # w1, b1
            const((F1, F2)), const((1, F2)),                   # w2, b2
            const((F2, F3)), const((1, F3)),                   # w3, b3
            const((1, F3)), const((1, 1)),                     # w4^T, b4
        ],
        out_specs=pl.BlockSpec((1, TILE_B), lambda i: (0, i)), # lane-dense output slab
        out_shape=jax.ShapeDtypeStruct((1, B_pad), jnp.float32),
        compiler_params=pltpu.CompilerParams(
            dimension_semantics=("parallel",),                 # megacore on v7x
            vmem_limit_bytes=32 * 1024 * 1024),
        cost_estimate=cost,
    )(xp, w1p, b1p, w2p, b2p, w3p, b3p, w4tp, b4p)

    return out[0, :B].reshape(B, 1)


def init_params(key, n_input_features):
    """Deterministic init matching the PyTorch layer shapes (weights stored [in, out])."""
    dims = [(n_input_features, n_input_features),
            (n_input_features, 30),
            (30, 20),
            (20, 1)]
    params = {}
    for i, (fan_in, fan_out) in enumerate(dims, start=1):
        key, wk, bk = jax.random.split(key, 3)
        bound = 1.0 / jnp.sqrt(fan_in)  # same scheme as nn.Linear default
        w = jax.random.uniform(wk, (fan_in, fan_out), jnp.float32, -bound, bound)
        b = jax.random.uniform(bk, (1, fan_out), jnp.float32, -bound, bound)
        params[f"l{i}"] = (w, b)
    return params


def reference_forward_f32(x, params):
    """Pure f32 reference matching the PyTorch module (eval mode)."""
    h = x
    for name in ("l1", "l2", "l3"):
        w, b = params[name]
        h = jnp.maximum(h @ w + b, 0.0)
    w, b = params["l4"]
    return jax.nn.sigmoid(h @ w + b)


def reference_forward_bf16(x, params):
    """Reference mirroring the kernel numerics: bf16 MXU operands, f32 accumulation."""
    h = x.astype(jnp.bfloat16)
    for name in ("l1", "l2", "l3"):
        w, b = params[name]
        h = jnp.dot(h, w.astype(jnp.bfloat16), preferred_element_type=jnp.float32) + b
        h = jnp.maximum(h, 0.0).astype(jnp.bfloat16)
    w, b = params["l4"]
    logits = jnp.dot(h, w.astype(jnp.bfloat16), preferred_element_type=jnp.float32) + b
    return jax.nn.sigmoid(logits)


if __name__ == "__main__":
    N_INPUT_FEATURES = 16
    BATCH = 8
    DROPOUT_P = 0.25  # unused at inference (eval-mode dropout == identity)

    key = jax.random.PRNGKey(0)
    key, xk = jax.random.split(key)
    x = jax.random.normal(xk, (BATCH, N_INPUT_FEATURES), jnp.float32)
    params = init_params(key, N_INPUT_FEATURES)

    prep = prepare_params(params)           # one-time weight prep (hoisted)
    y = simple_dnn_forward(x, prep)
    jax.block_until_ready(y)
    assert y.shape == (BATCH, 1)

    # Tight check against a reference with identical bf16-input / f32-accumulate numerics.
    y_bf16_ref = reference_forward_bf16(x, params)
    assert jnp.allclose(y, y_bf16_ref, atol=1e-4, rtol=1e-4), "mismatch vs bf16 reference"

    # Loose check against the pure-f32 PyTorch-equivalent forward (bf16 operand rounding).
    y_f32_ref = reference_forward_f32(x, params)
    assert jnp.allclose(y, y_f32_ref, atol=2e-2), "mismatch vs f32 reference"

    print("KERNEL_OK")
</pallas_src>

<mosaic_0001>
module attributes {stable_mosaic.version = 11 : i64} {
  func.func @_mlp_kernel(%arg0: i32, %arg1: memref<128x16xf32, #tpu.memory_space<vmem>>, %arg2: memref<16x128xbf16, #tpu.memory_space<vmem>>, %arg3: memref<1x128xf32, #tpu.memory_space<vmem>>, %arg4: memref<128x128xbf16, #tpu.memory_space<vmem>>, %arg5: memref<1x128xf32, #tpu.memory_space<vmem>>, %arg6: memref<128x128xbf16, #tpu.memory_space<vmem>>, %arg7: memref<1x128xf32, #tpu.memory_space<vmem>>, %arg8: memref<1x128xbf16, #tpu.memory_space<vmem>>, %arg9: memref<1x1xf32, #tpu.memory_space<vmem>>, %arg10: memref<1x128xf32, #tpu.memory_space<vmem>>) attributes {dimension_semantics = [#tpu.dimension_semantics<parallel>], iteration_bounds = array<i64: 1>, scalar_prefetch = 0 : i64, scratch_operands = 0 : i64, tpu.core_type = #tpu.core_type<tc>, window_params = [{transform_indices = @transform_0, window_bounds = array<i64: 128, 16>}, {pipeline_mode = #tpu.pipeline_mode<synchronous>, transform_indices = @transform_1, window_bounds = array<i64: 16, 128>}, {pipeline_mode = #tpu.pipeline_mode<synchronous>, transform_indices = @transform_2, window_bounds = array<i64: 1, 128>}, {pipeline_mode = #tpu.pipeline_mode<synchronous>, transform_indices = @transform_3, window_bounds = array<i64: 128, 128>}, {pipeline_mode = #tpu.pipeline_mode<synchronous>, transform_indices = @transform_4, window_bounds = array<i64: 1, 128>}, {pipeline_mode = #tpu.pipeline_mode<synchronous>, transform_indices = @transform_5, window_bounds = array<i64: 128, 128>}, {pipeline_mode = #tpu.pipeline_mode<synchronous>, transform_indices = @transform_6, window_bounds = array<i64: 1, 128>}, {pipeline_mode = #tpu.pipeline_mode<synchronous>, transform_indices = @transform_7, window_bounds = array<i64: 1, 128>}, {pipeline_mode = #tpu.pipeline_mode<synchronous>, transform_indices = @transform_8, window_bounds = array<i64: 1, 1>}, {transform_indices = @transform_9, window_bounds = array<i64: 1, 128>}]} {
    %c0_i32 = arith.constant 0 : i32
    %c128_i32 = arith.constant 128 : i32
    %0 = arith.muli %c0_i32, %c128_i32 : i32
    %1 = tpu.assume_multiple %0, 128 : i32
    %2 = arith.index_cast %1 : i32 to index
    %c0 = arith.constant 0 : index
    %3 = vector.load %arg1[%2, %c0] : memref<128x16xf32, #tpu.memory_space<vmem>>, vector<128x16xf32>
    %4 = arith.truncf %3 : vector<128x16xf32> to vector<128x16xbf16>
    %c0_0 = arith.constant 0 : index
    %c0_1 = arith.constant 0 : index
    %5 = vector.load %arg2[%c0_0, %c0_1] : memref<16x128xbf16, #tpu.memory_space<vmem>>, vector<16x128xbf16>
    %cst = arith.constant dense<0.000000e+00> : vector<128x128xf32>
    %6 = tpu.matmul %4, %5, %cst {dimension_numbers = #tpu.dot_dimension_numbers<[1], [0], [0], [1], [0, 0, 1, 1], [], []>} : vector<128x16xbf16>, vector<16x128xbf16>, vector<128x128xf32> -> vector<128x128xf32>
    %c0_2 = arith.constant 0 : index
    %c0_3 = arith.constant 0 : index
    %7 = vector.load %arg3[%c0_2, %c0_3] : memref<1x128xf32, #tpu.memory_space<vmem>>, vector<1x128xf32>
    %8 = vector.broadcast %7 : vector<1x128xf32> to vector<128x128xf32>
    %9 = arith.addf %6, %8 : vector<128x128xf32>
    %cst_4 = arith.constant 0.000000e+00 : f32
    %10 = vector.broadcast %cst_4 : f32 to vector<128x128xf32>
    %11 = arith.maximumf %9, %10 : vector<128x128xf32>
    %12 = arith.truncf %11 : vector<128x128xf32> to vector<128x128xbf16>
    %c0_5 = arith.constant 0 : index
    %c0_6 = arith.constant 0 : index
    %13 = vector.load %arg4[%c0_5, %c0_6] : memref<128x128xbf16, #tpu.memory_space<vmem>>, vector<128x128xbf16>
    %cst_7 = arith.constant dense<0.000000e+00> : vector<128x128xf32>
    %14 = tpu.matmul %12, %13, %cst_7 {dimension_numbers = #tpu.dot_dimension_numbers<[1], [0], [0], [1], [0, 0, 1, 1], [], []>} : vector<128x128xbf16>, vector<128x128xbf16>, vector<128x128xf32> -> vector<128x128xf32>
    %c0_8 = arith.constant 0 : index
    %c0_9 = arith.constant 0 : index
    %15 = vector.load %arg5[%c0_8, %c0_9] : memref<1x128xf32, #tpu.memory_space<vmem>>, vector<1x128xf32>
    %16 = vector.broadcast %15 : vector<1x128xf32> to vector<128x128xf32>
    %17 = arith.addf %14, %16 : vector<128x128xf32>
    %cst_10 = arith.constant 0.000000e+00 : f32
    %18 = vector.broadcast %cst_10 : f32 to vector<128x128xf32>
    %19 = arith.maximumf %17, %18 : vector<128x128xf32>
    %20 = arith.truncf %19 : vector<128x128xf32> to vector<128x128xbf16>
    %c0_11 = arith.constant 0 : index
    %c0_12 = arith.constant 0 : index
    %21 = vector.load %arg6[%c0_11, %c0_12] : memref<128x128xbf16, #tpu.memory_space<vmem>>, vector<128x128xbf16>
    %cst_13 = arith.constant dense<0.000000e+00> : vector<128x128xf32>
    %22 = tpu.matmul %20, %21, %cst_13 {dimension_numbers = #tpu.dot_dimension_numbers<[1], [0], [0], [1], [0, 0, 1, 1], [], []>} : vector<128x128xbf16>, vector<128x128xbf16>, vector<128x128xf32> -> vector<128x128xf32>
    %c0_14 = arith.constant 0 : index
    %c0_15 = arith.constant 0 : index
    %23 = vector.load %arg7[%c0_14, %c0_15] : memref<1x128xf32, #tpu.memory_space<vmem>>, vector<1x128xf32>
    %24 = vector.broadcast %23 : vector<1x128xf32> to vector<128x128xf32>
    %25 = arith.addf %22, %24 : vector<128x128xf32>
    %cst_16 = arith.constant 0.000000e+00 : f32
    %26 = vector.broadcast %cst_16 : f32 to vector<128x128xf32>
    %27 = arith.maximumf %25, %26 : vector<128x128xf32>
    %28 = arith.truncf %27 : vector<128x128xf32> to vector<128x128xbf16>
    %c0_17 = arith.constant 0 : index
    %c0_18 = arith.constant 0 : index
    %29 = vector.load %arg8[%c0_17, %c0_18] : memref<1x128xbf16, #tpu.memory_space<vmem>>, vector<1x128xbf16>
    %30 = tpu.transpose %28, [1, 0] : vector<128x128xbf16> -> vector<128x128xbf16>
    %cst_19 = arith.constant dense<0.000000e+00> : vector<1x128xf32>
    %31 = tpu.matmul %29, %30, %cst_19 {dimension_numbers = #tpu.dot_dimension_numbers<[1], [0], [0], [1], [0, 0, 1, 1], [], []>} : vector<1x128xbf16>, vector<128x128xbf16>, vector<1x128xf32> -> vector<1x128xf32>
    %c0_20 = arith.constant 0 : index
    %c0_21 = arith.constant 0 : index
    %32 = vector.load %arg9[%c0_20, %c0_21] : memref<1x1xf32, #tpu.memory_space<vmem>>, vector<1x1xf32>
    %33 = vector.broadcast %32 : vector<1x1xf32> to vector<1x128xf32>
    %34 = arith.addf %31, %33 : vector<1x128xf32>
    %35 = arith.negf %34 : vector<1x128xf32>
    %36 = math.exp %35 : vector<1x128xf32>
    %cst_22 = arith.constant 1.000000e+00 : f32
    %37 = vector.broadcast %cst_22 : f32 to vector<1x128xf32>
    %38 = arith.addf %37, %36 : vector<1x128xf32>
    %39 = arith.divf %37, %38 : vector<1x128xf32>
    %c0_23 = arith.constant 0 : index
    %40 = arith.index_cast %1 : i32 to index
    %41 = vector.load %arg10[%c0_23, %40] : memref<1x128xf32, #tpu.memory_space<vmem>>, vector<1x128xf32>
    tpu.vector_store %arg10[%c0_23, %40], %39 {strides = array<i32>} : memref<1x128xf32, #tpu.memory_space<vmem>>, vector<1x128xf32>,
    %c1_i32 = arith.constant 1 : i32
    return
  }
  func.func @transform_0(%arg0: i32) -> (i32, i32) {
    %c0_i32 = arith.constant 0 : i32
    %c0_i32_0 = arith.constant 0 : i32
    return %arg0, %c0_i32 : i32, i32
  }
  func.func @transform_1(%arg0: i32) -> (i32, i32) {
    %c0_i32 = arith.constant 0 : i32
    %c0_i32_0 = arith.constant 0 : i32
    %c0_i32_1 = arith.constant 0 : i32
    return %c0_i32, %c0_i32_0 : i32, i32
  }
  func.func @transform_2(%arg0: i32) -> (i32, i32) {
    %c0_i32 = arith.constant 0 : i32
    %c0_i32_0 = arith.constant 0 : i32
    %c0_i32_1 = arith.constant 0 : i32
    return %c0_i32, %c0_i32_0 : i32, i32
  }
  func.func @transform_3(%arg0: i32) -> (i32, i32) {
    %c0_i32 = arith.constant 0 : i32
    %c0_i32_0 = arith.constant 0 : i32
    %c0_i32_1 = arith.constant 0 : i32
    return %c0_i32, %c0_i32_0 : i32, i32
  }
  func.func @transform_4(%arg0: i32) -> (i32, i32) {
    %c0_i32 = arith.constant 0 : i32
    %c0_i32_0 = arith.constant 0 : i32
    %c0_i32_1 = arith.constant 0 : i32
    return %c0_i32, %c0_i32_0 : i32, i32
  }
  func.func @transform_5(%arg0: i32) -> (i32, i32) {
    %c0_i32 = arith.constant 0 : i32
    %c0_i32_0 = arith.constant 0 : i32
    %c0_i32_1 = arith.constant 0 : i32
    return %c0_i32, %c0_i32_0 : i32, i32
  }
  func.func @transform_6(%arg0: i32) -> (i32, i32) {
    %c0_i32 = arith.constant 0 : i32
    %c0_i32_0 = arith.constant 0 : i32
    %c0_i32_1 = arith.constant 0 : i32
    return %c0_i32, %c0_i32_0 : i32, i32
  }
  func.func @transform_7(%arg0: i32) -> (i32, i32) {
    %c0_i32 = arith.constant 0 : i32
    %c0_i32_0 = arith.constant 0 : i32
    %c0_i32_1 = arith.constant 0 : i32
    return %c0_i32, %c0_i32_0 : i32, i32
  }
  func.func @transform_8(%arg0: i32) -> (i32, i32) {
    %c0_i32 = arith.constant 0 : i32
    %c0_i32_0 = arith.constant 0 : i32
    %c0_i32_1 = arith.constant 0 : i32
    return %c0_i32, %c0_i32_0 : i32, i32
  }
  func.func @transform_9(%arg0: i32) -> (i32, i32) {
    %c0_i32 = arith.constant 0 : i32
    %c0_i32_0 = arith.constant 0 : i32
    return %c0_i32, %arg0 : i32, i32
  }
}

</mosaic_0001>

<bundles_post_ra>
// kernel: tpu_custom_call.1
= control target key start
LH: loop header
LB: loop body
LE: loop exit
PB: predicated region body
PF: predicated region fallthrough
CT: control target
= control target key end

     0   :  { %s1112_s0 = inlined_call_operand.vmem [shape: f32[128,16], index: 0, kind: input, shape index: {}]   ;;  %s1113_s1 = inlined_call_operand.vmem [shape: bf16[16,128], index: 1, kind: input, shape index: {}]   ;;  %s1114_s2 = inlined_call_operand.vmem [shape: f32[1,128], index: 2, kind: input, shape index: {}]   ;;  %s1115_s3 = inlined_call_operand.vmem [shape: bf16[128,128], index: 3, kind: input, shape index: {}]   ;;  %s1116_s4 = inlined_call_operand.vmem [shape: f32[1,128], index: 4, kind: input, shape index: {}]   ;;  %s1117_s5 = inlined_call_operand.vmem [shape: bf16[128,128], index: 5, kind: input, shape index: {}]   ;;  %s1118_s6 = inlined_call_operand.vmem [shape: f32[1,128], index: 6, kind: input, shape index: {}]   ;;  %s1119_s7 = inlined_call_operand.vmem [shape: bf16[1,128], index: 7, kind: input, shape index: {}]   ;;  %s1120_s8 = inlined_call_operand.<no memory space> [shape: f32[1,1], index: 8, kind: input, shape index: {}]   ;;  %s1121_s9 = inlined_call_operand.hbm [shape: f32[1,128], index: 9, kind: output, shape index: {}]  }
   0x1   :  { %v14_v0 = vstv %s1120_s8 }
   0x2   :  { %15 = vst [vmem:[#allocation2] sm:$0x1] %v14_v0 }
   0x3   :  { %v863_v1 = vld [vmem:[%s1113_s1] sm:$0xff]   ;;  %v37_v3 = vld [vmem:[%s1112_s0 + $0x8] sm:$0xff]  ;;  %vm75_vm0 = vcmask 130048   ;;  %v38_v4 = vld [vmem:[%s1112_s0 + $0x10] sm:$0xff] }
   0x4   :  { %v36_v2 = vld [vmem:[%s1112_s0] sm:$0xff]  ;;  %756 = vmatprep.subr.bf16.mxu1 %v863_v1  ;;  %v39_v6 = vld [vmem:[%s1112_s0 + $0x18] sm:$0xff]  ;;  %v41_v8 = vld [vmem:[%s1112_s0 + $0x28] sm:$0xff] }
   0x5   :  { %v52_v5 = vpack.c.bf16 %v37_v3, %v36_v2  ;;  %v40_v7 = vld [vmem:[%s1112_s0 + $0x20] sm:$0xff]  ;;  %757 = vmatpush3.bf16.msra.mxu1 %v863_v1  ;;  %v53_v9 = vpack.c.bf16 %v39_v6, %v38_v4  ;;  %v42_v11 = vld [vmem:[%s1112_s0 + $0x30] sm:$0xff]  ;;  %v43_v12 = vld [vmem:[%s1112_s0 + $0x38] sm:$0xff] }
   0x6   :  { %v54_v10 = vpack.c.bf16 %v41_v8, %v40_v7  ;;  %v44_v13 = vld [vmem:[%s1112_s0 + $0x40] sm:$0xff]  ;;  %v45_v14 = vld [vmem:[%s1112_s0 + $0x48] sm:$0xff]  ;;  %v864_v15 = vld [vmem:[%s1115_s3 + $0x38] sm:$0xff]   ;;  %v55_v17 = vpack.c.bf16 %v43_v12, %v42_v11 }
   0x7   :  { %758 = vmatprep.mubr.msk.bf16.mxu1 %vm75_vm0, %v52_v5  ;;  %v865_v16 = vld [vmem:[%s1115_s3 + $0x30] sm:$0xff]   ;;  %774 = vmatprep.subr.bf16.mxu0 %v864_v15  ;;  %v56_v18 = vpack.c.bf16 %v45_v14, %v44_v13  ;;  %v866_v19 = vld [vmem:[%s1115_s3 + $0x28] sm:$0xff]   ;;  %v47_v21 = vld [vmem:[%s1112_s0 + $0x58] sm:$0xff] }
   0x8   :  { %759 = vmatmul.mubr.msk.bf16.vlgmr.msra.gmra.mxu1 %vm75_vm0, %v53_v9  ;;  %775 = vmatpush3.bf16.msra.mxu0 %v864_v15  ;;  %v46_v20 = vld [vmem:[%s1112_s0 + $0x50] sm:$0xff]  ;;  %v867_v22 = vld [vmem:[%s1115_s3 + $0x20] sm:$0xff]   ;;  %v49_v24 = vld [vmem:[%s1112_s0 + $0x68] sm:$0xff] }
   0x9   :  { %762 = vmatprep.mubr.msk.bf16.mxu1 %vm75_vm0, %v54_v10  ;;  %776 = vmatprep.subr.bf16.mxu0 %v865_v16  ;;  %v48_v23 = vld [vmem:[%s1112_s0 + $0x60] sm:$0xff]  ;;  %v57_v25 = vpack.c.bf16 %v47_v21, %v46_v20 }
   0xc   :  { %777 = vmatpush3.bf16.msra.mxu0 %v865_v16 }
   0xd   :  { %778 = vmatprep.subr.bf16.mxu0 %v866_v19 }
  0x10   :  { %763 = vmatmul.mubr.msk.bf16.gmra.mxu1 %vm75_vm0, %v55_v17  ;;  %779 = vmatpush3.bf16.msra.mxu0 %v866_v19 }
  0x11   :  { %766 = vmatprep.mubr.msk.bf16.mxu1 %vm75_vm0, %v56_v18 }
  0x12   :  { %16 = vsyncpa [#allocation4], 0  ;;  %v58_v26 = vpack.c.bf16 %v49_v24, %v48_v23  ;;  %780 = vmatprep.subr.bf16.mxu0 %v867_v22  ;;  %v868_v27 = vld [vmem:[%s1115_s3 + $0x18] sm:$0xff]   ;;  %v50_v28 = vld [vmem:[%s1112_s0 + $0x70] sm:$0xff]  ;;  %vm907_vm1 = vmmov 0   ;;  %s909_s10 = smov [#allocation3]  }
  0x13   :  { %v51_v29 = vld [vmem:[%s1112_s0 + $0x78] sm:$0xff]  ;;  %v869_v31 = vld [vmem:[%s1115_s3 + $0x10] sm:$0xff]   ;;  %v870_v32 = vld [vmem:[%s1115_s3 + $0x8] sm:$0xff]   ;;  %s669_s11 = sshll.u32 %s909_s10, 4  ;;  %s670_s11 = int_to_ptr.vmem [resolvable:$true] %s669_s11 }
  0x14   :  { %781 = vmatpush3.bf16.msra.mxu0 %v867_v22  ;;  %v59_v30 = vpack.c.bf16 %v51_v29, %v50_v28  ;;  %v871_v33 = vld [vmem:[%s1115_s3] sm:$0xff]   ;;  %v872_v34 = vld [vmem:[%s1117_s5 + $0x38] sm:$0xff]   ;;  %v873_v53 = vld [vmem:[%s1117_s5 + $0x30] sm:$0xff]   ;;  %s888_s12 = scalar_lea.vmem %s670_s11, 32  ;;  %p889_p1 = scmp.lt.s32.totalorder %s670_s11, %s670_s11 }
  0x15   :  { %782 = vmatprep.subr.bf16.mxu0 %v868_v27  ;;  %v1052_v37 = vld [vmem:[%s1114_s2] ss:$0 sm:$0xff]  ;;  %v874_v61 = vld [vmem:[%s1117_s5 + $0x28] sm:$0xff]   ;;  %v876_v13 = vld [vmem:[%s1117_s5 + $0x18] sm:$0xff]  }
  0x16   :  { %v875_v5 = vld [vmem:[%s1117_s5 + $0x20] sm:$0xff]  }
  0x18   :  { %767 = vmatmul.mubr.msk.bf16.gmra.mxu1 %vm75_vm0, %v57_v25  ;;  %783 = vmatpush3.bf16.msra.mxu0 %v868_v27 }
  0x19   :  { %770 = vmatprep.mubr.msk.bf16.mxu1 %vm75_vm0, %v58_v26  ;;  %784 = vmatprep.subr.bf16.mxu0 %v869_v31 }
  0x1c   :  { %785 = vmatpush3.bf16.msra.mxu0 %v869_v31 }
  0x1d   :  { %786 = vmatprep.subr.bf16.mxu0 %v870_v32 }
  0x20   :  { %771 = vmatmul.mubr.msk.bf16.gmra.mxu1 %vm75_vm0, %v59_v30  ;;  %787 = vmatpush3.bf16.msra.mxu0 %v870_v32  ;;  %v877_v32 = vld [vmem:[%s1117_s5 + $0x10] sm:$0xff]  }
  0x21   :  { %788 = vmatprep.subr.bf16.mxu0 %v871_v33 }
  0x24   :  { %789 = vmatpush3.bf16.msra.mxu0 %v871_v33  ;;  %v878_v33 = vld [vmem:[%s1117_s5 + $0x8] sm:$0xff]  }
  0x25   :  { %806 = vmatprep.subr.bf16.mxu0 %v872_v34 }
  0xc8   :  { %v760_v35 = vpop.f32.mrf.mxu1 }
  0xc9   :  { %v143_v41 = vadd.f32 %v760_v35, %v1052_v37 }
  0xca   :  { %v134_v36 = vpop.f32.mrf.mxu1 }
  0xcb   :  { %v135_v39 = vadd.f32 %v1052_v37, %v134_v36  ;;  %v199_v48 = vmax.f32 %v143_v41, 0.0 }
  0xcc   :  { %v761_v38 = vpop.f32.mrf.mxu1 }
  0xcd   :  { %v146_v40 = vadd.f32 %v761_v38, %v1052_v37  ;;  %v197_v46 = vmax.f32 %v135_v39, 0.0 }
  0xce   :  { %v137_v42 = vpop.f32.mrf.mxu1 }
  0xcf   :  { %v138_v43 = vadd.f32 %v1052_v37, %v137_v42  ;;  %v200_v44 = vmax.f32 %v146_v40, 0.0 }
  0xd0   :  { %v764_v45 = vpop.f32.mrf.mxu1 }
  0xd1   :  { %v198_v47 = vmax.f32 %v138_v43, 0.0  ;;  %v214_v51 = vpack.c.bf16 %v200_v44, %v199_v48  ;;  %v159_v56 = vadd.f32 %v764_v45, %v1052_v37 }
  0xd2   :  { %v150_v49 = vpop.f32.mrf.mxu1 }
  0xd3   :  { %v213_v50 = vpack.c.bf16 %v198_v47, %v197_v46  ;;  %v151_v54 = vadd.f32 %v1052_v37, %v150_v49  ;;  %v203_v0 = vmax.f32 %v159_v56, 0.0 }
  0xd4   :  { %v765_v52 = vpop.f32.mrf.mxu1 }
  0xd5   :  { %v162_v55 = vadd.f32 %v765_v52, %v1052_v37  ;;  %790 = vmatprep.mubr.bf16.mxu0 %v213_v50  ;;  %v201_v62 = vmax.f32 %v151_v54, 0.0 }
  0xd6   :  { %v153_v57 = vpop.f32.mrf.mxu1  ;;  %791 = vmatmul.mubr.bf16.vlgmr.msra.gmra.mxu0 %v214_v51 }
  0xd7   :  { %v154_v58 = vadd.f32 %v1052_v37, %v153_v57  ;;  %807 = vmatpush3.bf16.msra.mxu0 %v872_v34  ;;  %v204_v59 = vmax.f32 %v162_v55, 0.0  ;;  %v879_v34 = vld [vmem:[%s1117_s5] sm:$0xff]  }
  0xd8   :  { %v768_v60 = vpop.f32.mrf.mxu1  ;;  %808 = vmatprep.subr.bf16.mxu0 %v873_v53 }
  0xd9   :  { %v202_v63 = vmax.f32 %v154_v58, 0.0  ;;  %v216_v3 = vpack.c.bf16 %v204_v59, %v203_v0  ;;  %v175_v8 = vadd.f32 %v768_v60, %v1052_v37 }
  0xda   :  { %v166_v1 = vpop.f32.mrf.mxu1 }
  0xdb   :  { %v215_v2 = vpack.c.bf16 %v202_v63, %v201_v62  ;;  %809 = vmatpush3.bf16.msra.mxu0 %v873_v53  ;;  %v167_v6 = vadd.f32 %v1052_v37, %v166_v1  ;;  %v207_v16 = vmax.f32 %v175_v8, 0.0 }
  0xdc   :  { %v769_v4 = vpop.f32.mrf.mxu1  ;;  %810 = vmatprep.subr.bf16.mxu0 %v874_v61 }
  0xdd   :  { %v178_v7 = vadd.f32 %v769_v4, %v1052_v37  ;;  %794 = vmatprep.mubr.bf16.mxu0 %v215_v2  ;;  %v205_v14 = vmax.f32 %v167_v6, 0.0 }
  0xde   :  { %v169_v9 = vpop.f32.mrf.mxu1  ;;  %795 = vmatmul.mubr.bf16.gmra.mxu0 %v216_v3 }
  0xdf   :  { %v170_v10 = vadd.f32 %v1052_v37, %v169_v9  ;;  %811 = vmatpush3.bf16.msra.mxu0 %v874_v61  ;;  %v208_v11 = vmax.f32 %v178_v7, 0.0 }
  0xe0   :  { %v772_v12 = vpop.f32.mrf.mxu1  ;;  %812 = vmatprep.subr.bf16.mxu0 %v875_v5 }
  0xe1   :  { %v206_v15 = vmax.f32 %v170_v10, 0.0  ;;  %v218_v19 = vpack.c.bf16 %v208_v11, %v207_v16  ;;  %v191_v23 = vadd.f32 %v772_v12, %v1052_v37 }
  0xe2   :  { %v182_v17 = vpop.f32.mrf.mxu1 }
  0xe3   :  { %v217_v18 = vpack.c.bf16 %v206_v15, %v205_v14  ;;  %813 = vmatpush3.bf16.msra.mxu0 %v875_v5  ;;  %v183_v21 = vadd.f32 %v1052_v37, %v182_v17  ;;  %v211_v29 = vmax.f32 %v191_v23, 0.0 }
  0xe4   :  { %v773_v20 = vpop.f32.mrf.mxu1  ;;  %814 = vmatprep.subr.bf16.mxu0 %v876_v13 }
  0xe5   :  { %v194_v22 = vadd.f32 %v773_v20, %v1052_v37  ;;  %798 = vmatprep.mubr.bf16.mxu0 %v217_v18  ;;  %v209_v27 = vmax.f32 %v183_v21, 0.0 }
  0xe6   :  { %v185_v24 = vpop.f32.mrf.mxu1  ;;  %799 = vmatmul.mubr.bf16.gmra.mxu0 %v218_v19 }
  0xe7   :  { %v186_v25 = vadd.f32 %v1052_v37, %v185_v24  ;;  %815 = vmatpush3.bf16.msra.mxu0 %v876_v13  ;;  %v212_v26 = vmax.f32 %v194_v22, 0.0  ;;  %v687_v37 = vld [vmem:[%s1116_s4] ss:$0 sm:$0xff] }
  0xe8   :  { %816 = vmatprep.subr.bf16.mxu0 %v877_v32 }
  0xe9   :  { %v210_v28 = vmax.f32 %v186_v25, 0.0  ;;  %v220_v31 = vpack.c.bf16 %v212_v26, %v211_v29  ;;  %v606_v29 = vld [vmem:[#allocation2] sm:$0x1] }
  0xeb   :  { %v219_v30 = vpack.c.bf16 %v210_v28, %v209_v27  ;;  %817 = vmatpush3.bf16.msra.mxu0 %v877_v32  ;;  %v906_v28 = vmov 0.0   ;;  %v696_v32 = vld [vmem:[%s1118_s6] ss:$0 sm:$0xff] }
  0xec   :  { %818 = vmatprep.subr.bf16.mxu0 %v878_v33  ;;  %838 = vmatprep.subr.bf16.mxu1 %v906_v28 }
  0xed   :  { %802 = vmatprep.mubr.bf16.mxu0 %v219_v30  ;;  %854 = vmatprep.mubr.msk.bf16.mxu1 %vm907_vm1, %v906_v28  ;;  %v908_v30 = vmov 0  }
  0xee   :  { %803 = vmatmul.mubr.bf16.gmra.mxu0 %v220_v31  ;;  %862 = vset.pattern.permute.xlu0 %v908_v30 }
  0xef   :  { %819 = vmatpush3.bf16.msra.mxu0 %v878_v33  ;;  %609 = vperm.xlu0 %862, %v606_v29  }
  0xf0   :  { %820 = vmatprep.subr.bf16.mxu0 %v879_v34 }
  0xf3   :  { %821 = vmatpush3.bf16.msra.mxu0 %v879_v34 }
 0x16a   :  { %v610_v29 = vpop.permute.xlu0 %609 }
 0x196   :  { %v792_v35 = vpop.f32.mrf.mxu0 }
 0x197   :  { %v335_v41 = vadd.f32 %v792_v35, %v687_v37 }
 0x198   :  { %v326_v36 = vpop.f32.mrf.mxu0 }
 0x199   :  { %v327_v39 = vadd.f32 %v687_v37, %v326_v36  ;;  %v391_v48 = vmax.f32 %v335_v41, 0.0 }
 0x19a   :  { %v793_v38 = vpop.f32.mrf.mxu0 }
 0x19b   :  { %v338_v40 = vadd.f32 %v793_v38, %v687_v37  ;;  %v389_v46 = vmax.f32 %v327_v39, 0.0 }
 0x19c   :  { %v329_v42 = vpop.f32.mrf.mxu0 }
 0x19d   :  { %v330_v43 = vadd.f32 %v687_v37, %v329_v42  ;;  %v392_v44 = vmax.f32 %v338_v40, 0.0 }
 0x19e   :  { %v796_v45 = vpop.f32.mrf.mxu0 }
 0x19f   :  { %v390_v47 = vmax.f32 %v330_v43, 0.0  ;;  %v406_v51 = vpack.c.bf16 %v392_v44, %v391_v48  ;;  %v351_v55 = vadd.f32 %v796_v45, %v687_v37 }
 0x1a0   :  { %v342_v49 = vpop.f32.mrf.mxu0 }
 0x1a1   :  { %v405_v50 = vpack.c.bf16 %v390_v47, %v389_v46  ;;  %v343_v53 = vadd.f32 %v687_v37, %v342_v49  ;;  %v395_v62 = vmax.f32 %v351_v55, 0.0 }
 0x1a2   :  { %v797_v52 = vpop.f32.mrf.mxu0 }
 0x1a3   :  { %v354_v54 = vadd.f32 %v797_v52, %v687_v37  ;;  %822 = vmatprep.mubr.bf16.mxu0 %v405_v50  ;;  %v393_v60 = vmax.f32 %v343_v53, 0.0 }
 0x1a4   :  { %v345_v56 = vpop.f32.mrf.mxu0  ;;  %823 = vmatmul.mubr.bf16.vlgmr.msra.gmra.mxu0 %v406_v51 }
 0x1a5   :  { %v346_v57 = vadd.f32 %v687_v37, %v345_v56  ;;  %v396_v58 = vmax.f32 %v354_v54, 0.0 }
 0x1a6   :  { %v800_v59 = vpop.f32.mrf.mxu0 }
 0x1a7   :  { %v394_v61 = vmax.f32 %v346_v57, 0.0  ;;  %v408_v1 = vpack.c.bf16 %v396_v58, %v395_v62  ;;  %v367_v5 = vadd.f32 %v800_v59, %v687_v37 }
 0x1a8   :  { %v358_v63 = vpop.f32.mrf.mxu0 }
 0x1a9   :  { %v407_v0 = vpack.c.bf16 %v394_v61, %v393_v60  ;;  %v359_v3 = vadd.f32 %v687_v37, %v358_v63  ;;  %v399_v12 = vmax.f32 %v367_v5, 0.0 }
 0x1aa   :  { %v801_v2 = vpop.f32.mrf.mxu0 }
 0x1ab   :  { %v370_v4 = vadd.f32 %v801_v2, %v687_v37  ;;  %826 = vmatprep.mubr.bf16.mxu0 %v407_v0  ;;  %v397_v10 = vmax.f32 %v359_v3, 0.0 }
 0x1ac   :  { %v361_v6 = vpop.f32.mrf.mxu0  ;;  %827 = vmatmul.mubr.bf16.gmra.mxu0 %v408_v1 }
 0x1ad   :  { %v362_v7 = vadd.f32 %v687_v37, %v361_v6  ;;  %v400_v8 = vmax.f32 %v370_v4, 0.0 }
 0x1ae   :  { %v804_v9 = vpop.f32.mrf.mxu0 }
 0x1af   :  { %v398_v11 = vmax.f32 %v362_v7, 0.0  ;;  %v410_v15 = vpack.c.bf16 %v400_v8, %v399_v12  ;;  %v383_v19 = vadd.f32 %v804_v9, %v687_v37 }
 0x1b0   :  { %v374_v13 = vpop.f32.mrf.mxu0 }
 0x1b1   :  { %v409_v14 = vpack.c.bf16 %v398_v11, %v397_v10  ;;  %v375_v17 = vadd.f32 %v687_v37, %v374_v13  ;;  %v403_v25 = vmax.f32 %v383_v19, 0.0 }
 0x1b2   :  { %v805_v16 = vpop.f32.mrf.mxu0 }
 0x1b3   :  { %v386_v18 = vadd.f32 %v805_v16, %v687_v37  ;;  %830 = vmatprep.mubr.bf16.mxu0 %v409_v14  ;;  %v401_v23 = vmax.f32 %v375_v17, 0.0 }
 0x1b4   :  { %v377_v20 = vpop.f32.mrf.mxu0  ;;  %831 = vmatmul.mubr.bf16.gmra.mxu0 %v410_v15 }
 0x1b5   :  { %v378_v21 = vadd.f32 %v687_v37, %v377_v20  ;;  %v404_v22 = vmax.f32 %v386_v18, 0.0 }
 0x1b7   :  { %v402_v24 = vmax.f32 %v378_v21, 0.0  ;;  %v412_v27 = vpack.c.bf16 %v404_v22, %v403_v25  ;;  %v612_v25 = vlaneseq }
 0x1b9   :  { %v411_v26 = vpack.c.bf16 %v402_v24, %v401_v23  ;;  %v605_v24 = vld [vmem:[%s1119_s7] sm:$0x1]  ;;  %s884_s7 = scalar_lea.vmem %s670_s11, 16 }
 0x1ba   :  { %p885_p0 = scmp.ne.s32.totalorder %s670_s11, %s884_s7  ;;  %p890_p2 = scmp.lt.s32.totalorder %s888_s12, %s884_s7 }
 0x1bb   :  { %834 = vmatprep.mubr.bf16.mxu0 %v411_v26  ;;  %v613_v26 = vshrl.u32 %v612_v25, 7 }
 0x1bc   :  { %835 = vmatmul.mubr.bf16.gmra.mxu0 %v412_v27  ;;  %p891_p3 = por %p890_p2, %p889_p1 }
 0x1bd   :  { %v614_v27 = vsub.s32 0, %v613_v26 }
 0x1be   :  { %p892_p4 = pnand %p891_p3, %p885_p0 }
 0x1bf   :  { %v615_v30 = vrot.slane %v610_v29, %v614_v27 }
 0x264   :  { %v824_v31 = vpop.f32.mrf.mxu0 }
 0x265   :  { %v527_v34 = vadd.f32 %v824_v31, %v696_v32 }
 0x266   :  { %v518_v33 = vpop.f32.mrf.mxu0 }
 0x267   :  { %v519_v36 = vadd.f32 %v696_v32, %v518_v33  ;;  %v583_v39 = vmax.f32 %v527_v34, 0.0 }
 0x268   :  { %v825_v35 = vpop.f32.mrf.mxu0 }
 0x269   :  { %v530_v37 = vadd.f32 %v825_v35, %v696_v32  ;;  %v581_v43 = vmax.f32 %v519_v36, 0.0 }
 0x26a   :  { %v521_v38 = vpop.f32.mrf.mxu0 }
 0x26b   :  { %v584_v40 = vmax.f32 %v530_v37, 0.0  ;;  %v522_v41 = vadd.f32 %v696_v32, %v521_v38 }
 0x26c   :  { %v828_v42 = vpop.f32.mrf.mxu0 }
 0x26d   :  { %v598_v44 = vpack.c.bf16 %v584_v40, %v583_v39  ;;  %v582_v45 = vmax.f32 %v522_v41, 0.0  ;;  %v543_v15 = vadd.f32 %v828_v42, %v696_v32 }
 0x26e   :  { %v534_v46 = vpop.f32.mrf.mxu0 }
 0x26f   :  { %v597_v47 = vpack.c.bf16 %v582_v45, %v581_v43  ;;  %v587_v17 = vmax.f32 %v543_v15, 0.0  ;;  %v535_v20 = vadd.f32 %v696_v32, %v534_v46 }
 0x270   :  { %v829_v48 = vpop.f32.mrf.mxu0 }
 0x271   :  { %v546_v13 = vadd.f32 %v829_v48, %v696_v32  ;;  %v585_v22 = vmax.f32 %v535_v20, 0.0 }
 0x272   :  { %v537_v49 = vpop.f32.mrf.mxu0 }
 0x273   :  { %v588_v16 = vmax.f32 %v546_v13, 0.0  ;;  %v538_v19 = vadd.f32 %v696_v32, %v537_v49 }
 0x274   :  { %v832_v50 = vpop.f32.mrf.mxu0 }
 0x275   :  { %v559_v5 = vadd.f32 %v832_v50, %v696_v32  ;;  %v600_v18 = vpack.c.bf16 %v588_v16, %v587_v17  ;;  %v586_v21 = vmax.f32 %v538_v19, 0.0 }
 0x276   :  { %v550_v51 = vpop.f32.mrf.mxu0 }
 0x277   :  { %v591_v7 = vmax.f32 %v559_v5, 0.0  ;;  %v551_v10 = vadd.f32 %v696_v32, %v550_v51  ;;  %v599_v23 = vpack.c.bf16 %v586_v21, %v585_v22 }
 0x278   :  { %v833_v52 = vpop.f32.mrf.mxu0 }
 0x279   :  { %v562_v3 = vadd.f32 %v833_v52, %v696_v32  ;;  %v589_v12 = vmax.f32 %v551_v10, 0.0 }
 0x27a   :  { %v553_v53 = vpop.f32.mrf.mxu0 }
 0x27b   :  { %v592_v6 = vmax.f32 %v562_v3, 0.0  ;;  %v554_v9 = vadd.f32 %v696_v32, %v553_v53 }
 0x27c   :  { %v836_v54 = vpop.f32.mrf.mxu0 }
 0x27d   :  { %v575_v56 = vadd.f32 %v836_v54, %v696_v32  ;;  %v602_v8 = vpack.c.bf16 %v592_v6, %v591_v7  ;;  %v590_v11 = vmax.f32 %v554_v9, 0.0 }
 0x27e   :  { %v566_v55 = vpop.f32.mrf.mxu0 }
 0x27f   :  { %v595_v60 = vmax.f32 %v575_v56, 0.0  ;;  %v567_v0 = vadd.f32 %v696_v32, %v566_v55  ;;  %v601_v14 = vpack.c.bf16 %v590_v11, %v589_v12 }
 0x280   :  { %v837_v57 = vpop.f32.mrf.mxu0 }
 0x281   :  { %v578_v58 = vadd.f32 %v837_v57, %v696_v32  ;;  %v593_v2 = vmax.f32 %v567_v0, 0.0 }
 0x282   :  { %v569_v59 = vpop.f32.mrf.mxu0 }
 0x283   :  { %v596_v61 = vmax.f32 %v578_v58, 0.0  ;;  %v570_v63 = vadd.f32 %v696_v32, %v569_v59 }
 0x285   :  { %v604_v62 = vpack.c.bf16 %v596_v61, %v595_v60  ;;  %v594_v1 = vmax.f32 %v570_v63, 0.0 }
 0x287   :  { %839 = vmatpush3.bf16.xpose.msra.mxu1 %v604_v62  ;;  %v603_v4 = vpack.c.bf16 %v594_v1, %v593_v2 }
 0x288   :  { %840 = vmatprep.subr.bf16.mxu1 %v906_v28 }
 0x28f   :  { %841 = vmatpush3.bf16.xpose.msra.mxu1 %v603_v4 }
 0x290   :  { %842 = vmatprep.subr.bf16.mxu1 %v906_v28 }
 0x297   :  { %843 = vmatpush3.bf16.xpose.msra.mxu1 %v602_v8 }
 0x298   :  { %844 = vmatprep.subr.bf16.mxu1 %v906_v28 }
 0x29f   :  { %845 = vmatpush3.bf16.xpose.msra.mxu1 %v601_v14 }
 0x2a0   :  { %846 = vmatprep.subr.bf16.mxu1 %v906_v28 }
 0x2a7   :  { %847 = vmatpush3.bf16.xpose.msra.mxu1 %v600_v18 }
 0x2a8   :  { %848 = vmatprep.subr.bf16.mxu1 %v906_v28 }
 0x2af   :  { %849 = vmatpush3.bf16.xpose.msra.mxu1 %v599_v23 }
 0x2b0   :  { %850 = vmatprep.subr.bf16.mxu1 %v906_v28 }
 0x2b7   :  { %851 = vmatpush3.bf16.xpose.msra.mxu1 %v598_v44 }
 0x2b8   :  { %852 = vmatprep.subr.bf16.mxu1 %v906_v28 }
 0x2bf   :  { %853 = vmatpush3.bf16.xpose.msra.mxu1 %v597_v47 }
 0x2c6   :  { %855 = vmatmul.mubr.bf16.vlgmr.msra.gmra.mxu1 %v605_v24 }
 0x386   :  { %v650_v31 = vpop.f32.mrf.mxu1 }
 0x387   :  { %v651_v32 = vadd.f32 %v650_v31, %v615_v30 }
 0x388   :  { %v856_v33 = vpop.f32.mrf.mxu1 }
 0x389   :  { %v705_v34 = vmul.f32 -1.442695, %v651_v32 }
 0x38a   :  { %v653_v35 = vpop.f32.mrf.mxu1 }
 0x38b   :  { %880 = vpow2.f32 %v705_v34 }
 0x38c   :  { %v857_v36 = vpop.f32.mrf.mxu1 }
 0x398   :  { %v881_v37 = vpop.eup %880 }
 0x399   :  { %v659_v28 = vadd.f32 1.0, %v881_v37 }
 0x39b   :  { %882 = vrcp.f32 %v659_v28 }
 0x3a8   :  { %v883_v38 = vpop.eup %882 }
 0x3a9   :  { %662 = vst [vmem:[#allocation3] sm:$0x1] %v883_v38 }
 0x3aa   :  { %895 = shalt.err (!%p892_p4)
}
 0x3ab   :  { %672 = dma.vmem_to_hbm [thread:$0]  %s670_s11, 16, %s1121_s9, [#allocation4]  }
 0x3ac   :  { %904 = dma.done.wait [#allocation4], 16  }
 0x3ad   :  { %905 = vsyncadd [#allocation4], 4294967280 }
 0x3ae   :  { %676 = vsyncpa [#allocation4], 1 }

</bundles_post_ra>
